<compile_context>
chip_gen: v7x
topology: tpu7x:2x2x1
jax: 0.10.0
libtpu: 0.0.40
codegen_flags: <defaults>
</compile_context>

<pallas_src>
import functools

import jax
import jax.numpy as jnp
from jax.experimental import pallas as pl
from jax.experimental.pallas import tpu as pltpu

_ACC_W = 2048                       # lane width of deferred-reduce accumulators
_DEFAULT_BLOCK_BYTES = 4 * 1024 * 1024


def _tversky_sums_kernel(yp_ref, yt_ref, tp_ref, syp_ref, syt_ref, *scratch,
                         valid_s, s_block, n_k, acc_w):
    """Per-row reductions over the spatial axis.

    yp_ref / yt_ref : (row_block, s_block) tiles, native dtype.
    tp/syp/syt refs : (row_block, 1) f32 outputs (resident across the S axis).
    scratch         : three (row_block, acc_w) f32 lane accumulators,
                      present only when the spatial axis is tiled (n_k > 1).
    """

    def load_tiles():
        # sigmoid(x) == 0.5 * tanh(0.5 * x) + 0.5 : single EUP transcendental.
        yp = 0.5 * jnp.tanh(0.5 * yp_ref[...].astype(jnp.float32)) + 0.5
        yt = yt_ref[...].astype(jnp.float32)
        return yp, yt

    if n_k == 1:
        # Whole spatial extent in one block (s_block == valid_s): reduce
        # directly, no masking and nothing to defer.
        yp, yt = load_tiles()
        tp_ref[...] = jnp.sum(yt * yp, axis=1, keepdims=True)
        syp_ref[...] = jnp.sum(yp, axis=1, keepdims=True)
        syt_ref[...] = jnp.sum(yt, axis=1, keepdims=True)
        return

    acc_tp, acc_yp, acc_yt = scratch
    k = pl.program_id(1)
    last = n_k - 1
    n_chunks = s_block // acc_w

    @pl.when(k == 0)
    def _():
        acc_tp[...] = jnp.zeros_like(acc_tp)
        acc_yp[...] = jnp.zeros_like(acc_yp)
        acc_yt[...] = jnp.zeros_like(acc_yt)

    def fold(x):
        # (row_block, s_block) -> (row_block, acc_w): 128-lane-aligned static
        # slices + elementwise adds (pure VPU, no XLU work per step).
        acc = x[:, :acc_w]
        for j in range(1, n_chunks):
            acc = acc + x[:, j * acc_w:(j + 1) * acc_w]
        return acc

    def accumulate(mask_tail):
        yp, yt = load_tiles()
        if mask_tail:
            col = k * s_block + jax.lax.broadcasted_iota(jnp.int32, yp.shape, 1)
            keep = col < valid_s
            yp = jnp.where(keep, yp, 0.0)
            yt = jnp.where(keep, yt, 0.0)
        acc_tp[...] += fold(yt * yp)
        acc_yp[...] += fold(yp)
        acc_yt[...] += fold(yt)

    if valid_s % s_block != 0:
        # Only the last spatial step needs the tail mask.
        @pl.when(k != last)
        def _():
            accumulate(False)

        @pl.when(k == last)
        def _():
            accumulate(True)
    else:
        accumulate(False)

    @pl.when(k == last)
    def _():
        # Single deferred cross-lane (XLU) reduce per quantity per row block.
        tp_ref[...] = jnp.sum(acc_tp[...], axis=1, keepdims=True)
        syp_ref[...] = jnp.sum(acc_yp[...], axis=1, keepdims=True)
        syt_ref[...] = jnp.sum(acc_yt[...], axis=1, keepdims=True)


def _choose_tiles(R, S, dtypes, target_bytes):
    """Pick (row_block, s_block).

    Blocks target ~`target_bytes` per input (amortizes per-step overhead);
    row blocks are rounded to the packed-sublane multiple of the narrowest
    streamed dtype (8/16/32 rows for 4/2/1-byte elements); when R allows it
    we keep >= 2 row blocks so both v7x TensorCores are covered.
    """
    itemsize = max(jnp.dtype(d).itemsize for d in dtypes)
    min_item = min(jnp.dtype(d).itemsize for d in dtypes)
    sub = max(8, 32 // max(min_item, 1))          # 8 f32 / 16 bf16 / 32 int8
    r_ceil = ((R + sub - 1) // sub) * sub

    if sub * S * itemsize <= target_bytes:
        s_block = S                                # reduction un-tiled
    else:
        s_block = max(_ACC_W,
                      (target_bytes // (sub * itemsize)) // _ACC_W * _ACC_W)
        if s_block >= S:
            s_block = S

    if s_block == S:
        row_block = max(sub, target_bytes // max(S * itemsize, 1))
        row_block = max(sub, min((row_block // sub) * sub, r_ceil, 4096))
        if R > sub:
            # Cap so the "parallel" row axis has >= 2 blocks (v7x megacore).
            half = -(-R // 2)
            cap = ((half + sub - 1) // sub) * sub
            cap = min(cap, ((R - 1) // sub) * sub)
            row_block = max(sub, min(row_block, cap))
    else:
        # Spatial axis tiled: minimal rows keeps the lane-accumulator scratch
        # tiny and still yields many parallel row blocks.
        row_block = sub

    return int(row_block), int(s_block)


def _pallas_tversky_sums(yp_rows, yt_rows, row_block, s_block):
    """yp_rows / yt_rows: (R, S) in native dtype.  Returns three (R, 1) f32."""
    R, S = yp_rows.shape
    n_k = pl.cdiv(S, s_block)
    grid = (pl.cdiv(R, row_block), n_k)

    kernel = functools.partial(_tversky_sums_kernel, valid_s=S,
                               s_block=s_block, n_k=n_k, acc_w=_ACC_W)

    in_spec = pl.BlockSpec((row_block, s_block), lambda i, k: (i, k))
    out_spec = pl.BlockSpec((row_block, 1), lambda i, k: (i, 0))
    out_sh = jax.ShapeDtypeStruct((R, 1), jnp.float32)

    scratch = []
    if n_k > 1:
        scratch = [pltpu.VMEM((row_block, _ACC_W), jnp.float32)] * 3

    return pl.pallas_call(
        kernel,
        out_shape=(out_sh, out_sh, out_sh),
        grid_spec=pltpu.PrefetchScalarGridSpec(
            num_scalar_prefetch=0,
            grid=grid,
            in_specs=[in_spec, in_spec],
            out_specs=[out_spec, out_spec, out_spec],
            scratch_shapes=scratch,
        ),
        compiler_params=pltpu.CompilerParams(
            dimension_semantics=("parallel", "arbitrary"),
            vmem_limit_bytes=40 * 1024 * 1024,
        ),
    )(yp_rows, yt_rows)


@functools.partial(jax.jit, static_argnames=("block_bytes",))
def tversky_loss(y_pred, y_true, alpha=0.5, beta=0.5, smooth=1e-10, *,
                 block_bytes=None):
    """Matches Tversky.forward: scalar loss = 1 - mean_over_classes(tversky)."""
    B, C, H, W = y_pred.shape
    R, S = B * C, H * W

    # Row-flattened views in native dtype (no extra HBM pass, no upcast pass).
    yp_rows = y_pred.reshape(R, S)
    yt_rows = y_true.reshape(R, S)

    target = _DEFAULT_BLOCK_BYTES if block_bytes is None else int(block_bytes)
    row_block, s_block = _choose_tiles(R, S, (y_pred.dtype, y_true.dtype),
                                       target)

    tp, s_yp, s_yt = _pallas_tversky_sums(yp_rows, yt_rows, row_block, s_block)

    # Tiny per-(b, c) combine + final scalar reduction in plain JAX.
    # fp = sum(yp*(1-yt)) = sum(yp) - tp ; fn = sum((1-yp)*yt) = sum(yt) - tp.
    tp = tp[:, 0].reshape(B, C)
    fp = s_yp[:, 0].reshape(B, C) - tp
    fn = s_yt[:, 0].reshape(B, C) - tp

    fp_fn = alpha * fp + beta * fn
    tversky_bc = (tp + smooth) / (tp + smooth + fp_fn)   # (B, C)
    tversky_per_class = jnp.mean(tversky_bc, axis=0)     # mean over batch
    tversky_sum = jnp.sum(tversky_per_class)             # sum over classes
    return 1.0 - tversky_sum / C


def _reference_tversky(y_pred, y_true, alpha=0.5, beta=0.5, smooth=1e-10):
    """Pure-JAX reference mirroring the PyTorch forward, for sanity checking."""
    y_pred = jax.nn.sigmoid(y_pred.astype(jnp.float32))
    y_true = y_true.astype(jnp.float32)
    B, C = y_true.shape[0], y_true.shape[1]
    total = 0.0
    for i in range(C):
        yt = y_true[:, i].reshape(B, -1)
        yp = y_pred[:, i].reshape(B, -1)
        tp = jnp.sum(yt * yp, axis=1)
        fp_fn = (alpha * jnp.sum(yp * (1 - yt), axis=1)
                 + beta * jnp.sum((1 - yp) * yt, axis=1))
        total = total + jnp.mean((tp + smooth) / (tp + smooth + fp_fn))
    return 1.0 - total / C


if __name__ == "__main__":
    key = jax.random.PRNGKey(0)
    k1, k2, k3, k4, k5, k6, k7, k8 = jax.random.split(key, 8)

    # 1) Primary small case: B=2, C=4, 16x16, f32.
    B, C, H, W = 2, 4, 16, 16
    y_pred = jax.random.normal(k1, (B, C, H, W), dtype=jnp.float32)
    y_true = (jax.random.uniform(k2, (B, C, H, W)) > 0.5).astype(jnp.float32)
    loss = jax.block_until_ready(tversky_loss(y_pred, y_true))
    ref = _reference_tversky(y_pred, y_true)
    assert jnp.allclose(loss, ref, atol=1e-5, rtol=1e-5), (loss, ref)

    # 2) Row-tail case: R = B*C = 15 is not a multiple of the row block.
    y_pred2 = jax.random.normal(k3, (3, 5, 20, 20), dtype=jnp.float32)
    y_true2 = (jax.random.uniform(k4, (3, 5, 20, 20)) > 0.5).astype(jnp.float32)
    loss2 = jax.block_until_ready(tversky_loss(y_pred2, y_true2))
    ref2 = _reference_tversky(y_pred2, y_true2)
    assert jnp.allclose(loss2, ref2, atol=1e-5, rtol=1e-5), (loss2, ref2)

    # 3) Forced spatial tiling (deferred lane-accumulate + last-step tail mask)
    #    via a deliberately tiny block budget so shapes stay small.
    y_pred3 = jax.random.normal(k5, (1, 2, 66, 64), dtype=jnp.float32)
    y_true3 = (jax.random.uniform(k6, (1, 2, 66, 64)) > 0.5).astype(jnp.float32)
    loss3 = jax.block_until_ready(
        tversky_loss(y_pred3, y_true3, block_bytes=64 * 1024))
    ref3 = _reference_tversky(y_pred3, y_true3)
    assert jnp.allclose(loss3, ref3, atol=1e-5, rtol=1e-5), (loss3, ref3)

    # 4) bf16 logits streamed natively (dtype-aware 16-row sublane rounding).
    y_pred4 = jax.random.normal(k7, (B, C, H, W), dtype=jnp.bfloat16)
    y_true4 = (jax.random.uniform(k8, (B, C, H, W)) > 0.5).astype(jnp.bfloat16)
    loss4 = jax.block_until_ready(tversky_loss(y_pred4, y_true4))
    ref4 = _reference_tversky(y_pred4, y_true4)
    assert jnp.allclose(loss4, ref4, atol=2e-3, rtol=2e-3), (loss4, ref4)

    print("KERNEL_OK")
</pallas_src>

<mosaic_0001>
module attributes {stable_mosaic.version = 11 : i64} {
  func.func @_tversky_sums_kernel(%arg0: i32, %arg1: i32, %arg2: memref<8x256xf32, #tpu.memory_space<vmem>>, %arg3: memref<8x256xf32, #tpu.memory_space<vmem>>, %arg4: memref<8x1xf32, #tpu.memory_space<vmem>>, %arg5: memref<8x1xf32, #tpu.memory_space<vmem>>, %arg6: memref<8x1xf32, #tpu.memory_space<vmem>>) attributes {dimension_semantics = [#tpu.dimension_semantics<parallel>, #tpu.dimension_semantics<arbitrary>], iteration_bounds = array<i64: 1, 1>, scalar_prefetch = 0 : i64, scratch_operands = 0 : i64, tpu.core_type = #tpu.core_type<tc>, window_params = [{transform_indices = @transform_0, window_bounds = array<i64: 8, 256>}, {transform_indices = @transform_1, window_bounds = array<i64: 8, 256>}, {transform_indices = @transform_2, window_bounds = array<i64: 8, 1>}, {transform_indices = @transform_3, window_bounds = array<i64: 8, 1>}, {transform_indices = @transform_4, window_bounds = array<i64: 8, 1>}]} {
    %c0 = arith.constant 0 : index
    %c0_0 = arith.constant 0 : index
    %0 = vector.load %arg2[%c0, %c0_0] : memref<8x256xf32, #tpu.memory_space<vmem>>, vector<8x256xf32>
    %cst = arith.constant 5.000000e-01 : f32
    %1 = vector.broadcast %cst : f32 to vector<8x256xf32>
    %2 = arith.mulf %1, %0 : vector<8x256xf32>
    %3 = math.tanh %2 : vector<8x256xf32>
    %cst_1 = arith.constant 5.000000e-01 : f32
    %4 = vector.broadcast %cst_1 : f32 to vector<8x256xf32>
    %5 = arith.mulf %4, %3 : vector<8x256xf32>
    %cst_2 = arith.constant 5.000000e-01 : f32
    %6 = vector.broadcast %cst_2 : f32 to vector<8x256xf32>
    %7 = arith.addf %5, %6 : vector<8x256xf32>
    %c0_3 = arith.constant 0 : index
    %c0_4 = arith.constant 0 : index
    %8 = vector.load %arg3[%c0_3, %c0_4] : memref<8x256xf32, #tpu.memory_space<vmem>>, vector<8x256xf32>
    %9 = arith.mulf %8, %7 : vector<8x256xf32>
    %cst_5 = arith.constant dense<0.000000e+00> : vector<8xf32>
    %10 = vector.multi_reduction <add>, %9, %cst_5 [1] : vector<8x256xf32> to vector<8xf32>
    %11 = vector.shape_cast %10 : vector<8xf32> to vector<8x1xf32>
    %c0_6 = arith.constant 0 : index
    %c0_7 = arith.constant 0 : index
    %12 = vector.load %arg4[%c0_6, %c0_7] : memref<8x1xf32, #tpu.memory_space<vmem>>, vector<8x1xf32>
    tpu.vector_store %arg4[%c0_6, %c0_7], %11 {strides = array<i32>} : memref<8x1xf32, #tpu.memory_space<vmem>>, vector<8x1xf32>,
    %cst_8 = arith.constant dense<0.000000e+00> : vector<8xf32>
    %13 = vector.multi_reduction <add>, %7, %cst_8 [1] : vector<8x256xf32> to vector<8xf32>
    %14 = vector.shape_cast %13 : vector<8xf32> to vector<8x1xf32>
    %c0_9 = arith.constant 0 : index
    %c0_10 = arith.constant 0 : index
    %15 = vector.load %arg5[%c0_9, %c0_10] : memref<8x1xf32, #tpu.memory_space<vmem>>, vector<8x1xf32>
    tpu.vector_store %arg5[%c0_9, %c0_10], %14 {strides = array<i32>} : memref<8x1xf32, #tpu.memory_space<vmem>>, vector<8x1xf32>,
    %cst_11 = arith.constant dense<0.000000e+00> : vector<8xf32>
    %16 = vector.multi_reduction <add>, %8, %cst_11 [1] : vector<8x256xf32> to vector<8xf32>
    %17 = vector.shape_cast %16 : vector<8xf32> to vector<8x1xf32>
    %c0_12 = arith.constant 0 : index
    %c0_13 = arith.constant 0 : index
    %18 = vector.load %arg6[%c0_12, %c0_13] : memref<8x1xf32, #tpu.memory_space<vmem>>, vector<8x1xf32>
    tpu.vector_store %arg6[%c0_12, %c0_13], %17 {strides = array<i32>} : memref<8x1xf32, #tpu.memory_space<vmem>>, vector<8x1xf32>,
    return
  }
  func.func @transform_0(%arg0: i32, %arg1: i32) -> (i32, i32) {
    %c0_i32 = arith.constant 0 : i32
    return %arg0, %arg1 : i32, i32
  }
  func.func @transform_1(%arg0: i32, %arg1: i32) -> (i32, i32) {
    %c0_i32 = arith.constant 0 : i32
    return %arg0, %arg1 : i32, i32
  }
  func.func @transform_2(%arg0: i32, %arg1: i32) -> (i32, i32) {
    %c0_i32 = arith.constant 0 : i32
    %c0_i32_0 = arith.constant 0 : i32
    return %arg0, %c0_i32 : i32, i32
  }
  func.func @transform_3(%arg0: i32, %arg1: i32) -> (i32, i32) {
    %c0_i32 = arith.constant 0 : i32
    %c0_i32_0 = arith.constant 0 : i32
    return %arg0, %c0_i32 : i32, i32
  }
  func.func @transform_4(%arg0: i32, %arg1: i32) -> (i32, i32) {
    %c0_i32 = arith.constant 0 : i32
    %c0_i32_0 = arith.constant 0 : i32
    return %arg0, %c0_i32 : i32, i32
  }
}

</mosaic_0001>

<bundles_post_ra>
// kernel: tversky_loss.1
= control target key start
LH: loop header
LB: loop body
LE: loop exit
PB: predicated region body
PF: predicated region fallthrough
CT: control target
= control target key end

     0   :  { %vm31_vm0 = vcmask 7168   ;;  %s103_s0 = inlined_call_operand.vmem [shape: f32[8,256], index: 0, kind: input, shape index: {}]   ;;  %s104_s1 = inlined_call_operand.vmem [shape: f32[8,256], index: 1, kind: input, shape index: {}]   ;;  %s105_s4 = inlined_call_operand.vmem [shape: f32[8,1], index: 4, kind: output, shape index: {2}]   ;;  %s106_s2 = inlined_call_operand.vmem [shape: f32[8,1], index: 2, kind: output, shape index: {0}]   ;;  %s107_s3 = inlined_call_operand.vmem [shape: f32[8,1], index: 3, kind: output, shape index: {1}]  }
   0x1   :  { %v14_v0 = vld [vmem:[%s103_s0] sm:$0xff]  ;;  %v15_v1 = vld [vmem:[%s103_s0 + $0x8] sm:$0xff] }
   0x2   :  { %v16_v2 = vmul.f32 0.5, %v14_v0  ;;  %v17_v3 = vmul.f32 0.5, %v15_v1  ;;  %v24_v4 = vld [vmem:[%s104_s1] sm:$0xff]  ;;  %v25_v5 = vld [vmem:[%s104_s1 + $0x8] sm:$0xff] }
   0x3   :  { %v37_v6 = vadd.f32 %v25_v5, %v24_v4 }
   0x4   :  { %53 = vtanh.f32 %v16_v2 }
   0x5   :  { %55 = vtanh.f32 %v17_v3  ;;  %38 = vadd.xlane.f32.xlu1 %v37_v6 }
   0xe   :  { %v54_v7 = vpop.eup %53 }
   0xf   :  { %v56_v8 = vpop.eup %55  ;;  %v20_v9 = vmul.f32 0.5, %v54_v7 }
  0x10   :  { %v21_v10 = vmul.f32 0.5, %v56_v8 }
  0x11   :  { %v22_v11 = vadd.f32 0.5, %v20_v9 }
  0x12   :  { %v23_v12 = vadd.f32 0.5, %v21_v10 }
  0x13   :  { %v26_v13 = vmul.f32 %v24_v4, %v22_v11 }
  0x14   :  { %v27_v14 = vmul.f32 %v25_v5, %v23_v12  ;;  %v33_v16 = vadd.f32 %v23_v12, %v22_v11 }
  0x16   :  { %v28_v15 = vadd.f32 %v27_v14, %v26_v13 }
  0x18   :  { %29 = vadd.xlane.f32.xlu0 %v28_v15 }
  0x1c   :  { %34 = vadd.xlane.f32.xlu0 %v33_v16 }
  0x92   :  { %v39_v17 = vpop.xlane.xlu1 %38 }
  0x93   :  { %40 = vst.msk [vmem:[%s105_s4] sm:$0xff] %vm31_vm0, %v39_v17 }
  0xa5   :  { %v30_v18 = vpop.xlane.xlu0 %29 }
  0xa6   :  { %32 = vst.msk [vmem:[%s106_s2] sm:$0xff] %vm31_vm0, %v30_v18 }
  0xa9   :  { %v35_v19 = vpop.xlane.xlu0 %34 }
  0xaa   :  { %36 = vst.msk [vmem:[%s107_s3] sm:$0xff] %vm31_vm0, %v35_v19 }

</bundles_post_ra>
